<compile_context>
chip_gen: v5e
topology: v5e:2x2
jax: 0.10.0
libtpu: 0.0.40
codegen_flags: <defaults>
</compile_context>

<pallas_src>
import math

import jax
import jax.numpy as jnp
from jax.experimental import pallas as pl
from jax.experimental.pallas import tpu as pltpu


# ---------------------------------------------------------------------------
# Pallas kernel
# ---------------------------------------------------------------------------
def make_rainbow_kernel(n_flat):
    """n_flat = out_dim * atom_size (static)."""

    def kernel(x_ref, wf_ref, bf_ref, wh_ref, bh_ref, whead_ref, bhead_ref,
               helper_ref, q_ref):
        x = x_ref[...]                                                # (bm, in_dim)

        # feature_layer: Linear(in_dim, 128) + ReLU
        feat = jnp.dot(x, wf_ref[...],
                       preferred_element_type=jnp.float32) + bf_ref[...]
        feat = jnp.maximum(feat, 0.0)                                 # (bm, 128)

        # fused advantage/value hidden NoisyLinears (128 -> 256) + ReLU
        # lanes [0:128] = advantage_hidden, lanes [128:256] = value_hidden.
        hid = jnp.dot(feat, wh_ref[...],
                      preferred_element_type=jnp.float32) + bh_ref[...]
        hid = jnp.maximum(hid, 0.0)                                   # (bm, 256)

        # fused dueling head (256 -> N); dueling combine already folded into
        # whead/bhead, so this IS the centered q_atoms slab.
        q_atoms = jnp.dot(hid, whead_ref[...],
                          preferred_element_type=jnp.float32) + bhead_ref[...]

        # Vectorized per-action softmax over atoms on the whole (bm, N) slab.
        # A single row-wide max is a valid shift for every segment (softmax is
        # shift-invariant per segment); one exp pass over the slab.
        m = jnp.max(q_atoms, axis=-1, keepdims=True)                  # (bm, 1)
        e = jnp.exp(q_atoms - m)                                      # (bm, N)

        # Segment sums, already lane-expanded, via one block-of-ones matmul.
        seg = jnp.dot(e, helper_ref[:, :n_flat],
                      preferred_element_type=jnp.float32)             # (bm, N)
        # Guard against a fully-underflowed segment (seg==0 -> Inf/NaN).
        seg = jnp.maximum(seg, 1e-30)
        dist = jnp.maximum(e / seg, 0.001)                            # clamp(min=0.001)

        # Expected Q for all actions in one matmul against block-diag(support).
        q_ref[...] = jnp.dot(dist, helper_ref[:, n_flat:],
                             preferred_element_type=jnp.float32)      # (bm, out_dim)

    return kernel


# ---------------------------------------------------------------------------
# Parameter construction (plain JAX) — mirrors PyTorch Linear / NoisyLinear
# (factorized gaussian noise) initializers.
# ---------------------------------------------------------------------------
def _scale_noise(key, size):
    x = jax.random.normal(key, (size,), dtype=jnp.float32)
    return jnp.sign(x) * jnp.sqrt(jnp.abs(x))


def _linear_params(key, in_f, out_f):
    k = 1.0 / math.sqrt(in_f)
    kw, kb = jax.random.split(key)
    w = jax.random.uniform(kw, (in_f, out_f), jnp.float32, -k, k)
    b = jax.random.uniform(kb, (1, out_f), jnp.float32, -k, k)
    return w, b


def _noisy_linear_params(key, in_f, out_f, std_init=0.5):
    """Effective weight/bias used by NoisyLinear.forward:
       W = w_mu + w_sigma * w_eps,  b = b_mu + b_sigma * b_eps."""
    mu_range = 1.0 / math.sqrt(in_f)
    kwm, kbm, kein, keout = jax.random.split(key, 4)
    w_mu = jax.random.uniform(kwm, (out_f, in_f), jnp.float32, -mu_range, mu_range)
    w_sigma = jnp.full((out_f, in_f), std_init / math.sqrt(in_f), jnp.float32)
    b_mu = jax.random.uniform(kbm, (out_f,), jnp.float32, -mu_range, mu_range)
    b_sigma = jnp.full((out_f,), std_init / math.sqrt(out_f), jnp.float32)

    eps_in = _scale_noise(kein, in_f)
    eps_out = _scale_noise(keout, out_f)
    w_eps = jnp.outer(eps_out, eps_in)
    b_eps = eps_out

    w_eff = (w_mu + w_sigma * w_eps).T          # (in_f, out_f)
    b_eff = (b_mu + b_sigma * b_eps)[None, :]   # (1, out_f)
    return w_eff, b_eff


def make_rainbow_params(key, in_dim, out_dim, atom_size):
    k1, k2, k3, k4, k5 = jax.random.split(key, 5)
    wf, bf = _linear_params(k1, in_dim, 128)
    wah, bah = _noisy_linear_params(k2, 128, 128)
    wa, ba = _noisy_linear_params(k3, 128, out_dim * atom_size)
    wvh, bvh = _noisy_linear_params(k4, 128, 128)
    wv, bv = _noisy_linear_params(k5, 128, atom_size)
    return dict(wf=wf, bf=bf, wah=wah, bah=bah, wvh=wvh, bvh=bvh,
                wa=wa, ba=ba, wv=wv, bv=bv)


# ---------------------------------------------------------------------------
# One-time parameter fusion (plain JAX, outside the kernel).
# ---------------------------------------------------------------------------
def fuse_rainbow_params(params, support, out_dim, atom_size):
    A, O = atom_size, out_dim
    N = O * A

    # dueling-combine matrices:
    #   adv @ (I - mean_mat @ tile_mat) == adv - adv.mean(over actions, broadcast)
    #   val @ tile_mat                  == val broadcast over actions
    mean_mat = jnp.tile(jnp.eye(A, dtype=jnp.float32), (O, 1)) / O        # (N, A)
    tile_mat = jnp.tile(jnp.eye(A, dtype=jnp.float32), (1, O))            # (A, N)
    center = jnp.eye(N, dtype=jnp.float32) - mean_mat @ tile_mat          # (N, N)

    # hidden NoisyLinears side by side (MXU-native N=256)
    w_hidden = jnp.concatenate([params["wah"], params["wvh"]], axis=1)    # (128, 256)
    b_hidden = jnp.concatenate([params["bah"], params["bvh"]], axis=1)    # (1, 256)

    # fused heads with dueling fold: rows 0:128 act on adv_hidden lanes,
    # rows 128:256 act on value_hidden lanes.
    wa_c = params["wa"] @ center                                          # (128, N)
    ba_c = params["ba"] @ center                                          # (1, N)
    wv_t = params["wv"] @ tile_mat                                        # (128, N)
    bv_t = params["bv"] @ tile_mat                                        # (1, N)
    w_head = jnp.concatenate([wa_c, wv_t], axis=0)                        # (256, N)
    b_head = ba_c + bv_t                                                  # (1, N)

    # post-softmax helpers, consolidated into ONE operand:
    #   ones_block[k, j] = 1 if k,j are in the same action segment   (N, N)
    #   sup_block[k, o]  = support[k % A] if k in segment o else 0   (N, O)
    seg_id = jnp.arange(N) // A
    ones_block = (seg_id[:, None] == seg_id[None, :]).astype(jnp.float32)
    seg_onehot = jnp.repeat(jnp.eye(O, dtype=jnp.float32), A, axis=0)     # (N, O)
    sup_block = seg_onehot * jnp.tile(support.astype(jnp.float32), O)[:, None]
    helper = jnp.concatenate([ones_block, sup_block], axis=1)             # (N, N+O)

    return dict(wf=params["wf"], bf=params["bf"],
                w_hidden=w_hidden, b_hidden=b_hidden,
                w_head=w_head, b_head=b_head,
                helper=helper)


# ---------------------------------------------------------------------------
# Wrapper: generation-aware batch-tiled grid, weights resident as full blocks.
# ---------------------------------------------------------------------------
_BM_CAP = 4096   # ~12 MB f32 activations at bm=4096: safe under the 32 MiB
                 # scoped VMEM we request, and well under v7x's 64 MiB physical.


def _num_tensorcores():
    """Best-effort TensorCores-per-chip (v7x has 2, v5e/v6e have 1)."""
    n = None
    try:
        info = pltpu.get_tpu_info()
        for name in ("tensorcores_per_chip", "num_cores", "core_count"):
            v = getattr(info, name, None)
            if v is not None:
                try:
                    v = int(v)
                except (TypeError, ValueError):
                    continue
                if v > 0:
                    n = v
                    break
    except Exception:
        pass
    if n is None:
        try:
            kind = jax.devices()[0].device_kind.lower()
        except Exception:
            kind = ""
        n = 2 if "v7" in kind else 1
    return max(1, min(int(n), 2))


def _pick_batch_tile(B, num_tc):
    """Rows per grid step.

    v7x (2 TCs): >= num_tc 'parallel' grid steps so both cores get work.
    v5e/v6e (1 TC): one big step — each grid step is ~0.35 us fixed overhead,
    which dominates this tiny-FLOP kernel.
    Block first-dim must be a multiple of 8 unless it equals B.
    """
    if num_tc >= 2 and B >= 16:
        bm = (B + num_tc - 1) // num_tc          # ceil(B / num_tc)
    else:
        bm = B
    bm = min(bm, _BM_CAP)
    if bm != B:
        bm = ((bm + 7) // 8) * 8                 # sublane-multiple tile
        bm = min(bm, _BM_CAP)
    if bm >= B:
        return B                                 # single full-array block
    return bm


def rainbow_dqn_forward(x, fused):
    B, in_dim = x.shape
    n_flat = fused["helper"].shape[0]                 # out_dim * atom_size
    out_dim = fused["helper"].shape[1] - n_flat

    bm = _pick_batch_tile(B, _num_tensorcores())
    grid = (pl.cdiv(B, bm),)

    def full_block(arr):
        # Constant block index -> weight DMA'd once, stays resident in VMEM
        # across all grid steps (do NOT re-index these per step).
        return pl.BlockSpec(arr.shape, lambda i: (0,) * arr.ndim)

    weights = (fused["wf"], fused["bf"],
               fused["w_hidden"], fused["b_hidden"],
               fused["w_head"], fused["b_head"],
               fused["helper"])

    return pl.pallas_call(
        make_rainbow_kernel(n_flat),
        out_shape=jax.ShapeDtypeStruct((B, out_dim), jnp.float32),
        grid=grid,
        in_specs=[pl.BlockSpec((bm, in_dim), lambda i: (i, 0))]
                 + [full_block(w) for w in weights],
        out_specs=pl.BlockSpec((bm, out_dim), lambda i: (i, 0)),
        compiler_params=pltpu.CompilerParams(
            dimension_semantics=("parallel",),
            vmem_limit_bytes=32 * 1024 * 1024),
    )(x, *weights)


# ---------------------------------------------------------------------------
# Pure-JAX reference (mirrors the PyTorch forward exactly).
# ---------------------------------------------------------------------------
def rainbow_dqn_reference(x, params, support, out_dim, atom_size):
    feat = jax.nn.relu(x @ params["wf"] + params["bf"])
    adv_h = jax.nn.relu(feat @ params["wah"] + params["bah"])
    val_h = jax.nn.relu(feat @ params["wvh"] + params["bvh"])
    adv = (adv_h @ params["wa"] + params["ba"]).reshape(-1, out_dim, atom_size)
    val = (val_h @ params["wv"] + params["bv"]).reshape(-1, 1, atom_size)
    q_atoms = val + adv - adv.mean(axis=1, keepdims=True)
    dist = jax.nn.softmax(q_atoms, axis=-1)
    dist = jnp.maximum(dist, 0.001)          # dist.clamp(min=0.001)
    return jnp.sum(dist * support, axis=2)


if __name__ == "__main__":
    B, IN_DIM, OUT_DIM, ATOM_SIZE = 8, 32, 4, 16

    key = jax.random.PRNGKey(0)
    kx, kp = jax.random.split(key)
    x = jax.random.normal(kx, (B, IN_DIM), dtype=jnp.float32)
    params = make_rainbow_params(kp, IN_DIM, OUT_DIM, ATOM_SIZE)
    support = jnp.linspace(0.0, 10.0, ATOM_SIZE, dtype=jnp.float32)

    # TODO(synk): NoisyLinear.reset_noise() is a host-side resampling step; it
    # is modeled here by re-running make_rainbow_params / fuse_rainbow_params.
    fused = fuse_rainbow_params(params, support, OUT_DIM, ATOM_SIZE)
    q = rainbow_dqn_forward(x, fused)
    q = jax.block_until_ready(q)

    q_ref = rainbow_dqn_reference(x, params, support, OUT_DIM, ATOM_SIZE)
    assert q.shape == (B, OUT_DIM)
    assert jnp.allclose(q, q_ref, atol=1e-4, rtol=1e-4), (q, q_ref)

    print("KERNEL_OK")
</pallas_src>

<mosaic_0001>
module attributes {stable_mosaic.version = 11 : i64} {
  func.func @kernel(%arg0: i32, %arg1: memref<8x32xf32, #tpu.memory_space<vmem>>, %arg2: memref<32x128xf32, #tpu.memory_space<vmem>>, %arg3: memref<1x128xf32, #tpu.memory_space<vmem>>, %arg4: memref<128x256xf32, #tpu.memory_space<vmem>>, %arg5: memref<1x256xf32, #tpu.memory_space<vmem>>, %arg6: memref<256x64xf32, #tpu.memory_space<vmem>>, %arg7: memref<1x64xf32, #tpu.memory_space<vmem>>, %arg8: memref<64x68xf32, #tpu.memory_space<vmem>>, %arg9: memref<8x4xf32, #tpu.memory_space<vmem>>) attributes {dimension_semantics = [#tpu.dimension_semantics<parallel>], iteration_bounds = array<i64: 1>, scalar_prefetch = 0 : i64, scratch_operands = 0 : i64, tpu.core_type = #tpu.core_type<tc>, window_params = [{transform_indices = @transform_0, window_bounds = array<i64: 8, 32>}, {pipeline_mode = #tpu.pipeline_mode<synchronous>, transform_indices = @transform_1, window_bounds = array<i64: 32, 128>}, {pipeline_mode = #tpu.pipeline_mode<synchronous>, transform_indices = @transform_2, window_bounds = array<i64: 1, 128>}, {pipeline_mode = #tpu.pipeline_mode<synchronous>, transform_indices = @transform_3, window_bounds = array<i64: 128, 256>}, {pipeline_mode = #tpu.pipeline_mode<synchronous>, transform_indices = @transform_4, window_bounds = array<i64: 1, 256>}, {pipeline_mode = #tpu.pipeline_mode<synchronous>, transform_indices = @transform_5, window_bounds = array<i64: 256, 64>}, {pipeline_mode = #tpu.pipeline_mode<synchronous>, transform_indices = @transform_6, window_bounds = array<i64: 1, 64>}, {pipeline_mode = #tpu.pipeline_mode<synchronous>, transform_indices = @transform_7, window_bounds = array<i64: 64, 68>}, {transform_indices = @transform_8, window_bounds = array<i64: 8, 4>}]} {
    %c0 = arith.constant 0 : index
    %c0_0 = arith.constant 0 : index
    %0 = vector.load %arg1[%c0, %c0_0] : memref<8x32xf32, #tpu.memory_space<vmem>>, vector<8x32xf32>
    %c0_1 = arith.constant 0 : index
    %c0_2 = arith.constant 0 : index
    %1 = vector.load %arg2[%c0_1, %c0_2] : memref<32x128xf32, #tpu.memory_space<vmem>>, vector<32x128xf32>
    %cst = arith.constant dense<0.000000e+00> : vector<8x128xf32>
    %2 = tpu.matmul %0, %1, %cst {dimension_numbers = #tpu.dot_dimension_numbers<[1], [0], [0], [1], [0, 0, 1, 1], [], []>} : vector<8x32xf32>, vector<32x128xf32>, vector<8x128xf32> -> vector<8x128xf32>
    %c0_3 = arith.constant 0 : index
    %c0_4 = arith.constant 0 : index
    %3 = vector.load %arg3[%c0_3, %c0_4] : memref<1x128xf32, #tpu.memory_space<vmem>>, vector<1x128xf32>
    %4 = vector.broadcast %3 : vector<1x128xf32> to vector<8x128xf32>
    %5 = arith.addf %2, %4 : vector<8x128xf32>
    %cst_5 = arith.constant 0.000000e+00 : f32
    %6 = vector.broadcast %cst_5 : f32 to vector<8x128xf32>
    %7 = arith.maximumf %5, %6 : vector<8x128xf32>
    %c0_6 = arith.constant 0 : index
    %c0_7 = arith.constant 0 : index
    %8 = vector.load %arg4[%c0_6, %c0_7] : memref<128x256xf32, #tpu.memory_space<vmem>>, vector<128x256xf32>
    %cst_8 = arith.constant dense<0.000000e+00> : vector<8x256xf32>
    %9 = tpu.matmul %7, %8, %cst_8 {dimension_numbers = #tpu.dot_dimension_numbers<[1], [0], [0], [1], [0, 0, 1, 1], [], []>} : vector<8x128xf32>, vector<128x256xf32>, vector<8x256xf32> -> vector<8x256xf32>
    %c0_9 = arith.constant 0 : index
    %c0_10 = arith.constant 0 : index
    %10 = vector.load %arg5[%c0_9, %c0_10] : memref<1x256xf32, #tpu.memory_space<vmem>>, vector<1x256xf32>
    %11 = vector.broadcast %10 : vector<1x256xf32> to vector<8x256xf32>
    %12 = arith.addf %9, %11 : vector<8x256xf32>
    %cst_11 = arith.constant 0.000000e+00 : f32
    %13 = vector.broadcast %cst_11 : f32 to vector<8x256xf32>
    %14 = arith.maximumf %12, %13 : vector<8x256xf32>
    %c0_12 = arith.constant 0 : index
    %c0_13 = arith.constant 0 : index
    %15 = vector.load %arg6[%c0_12, %c0_13] : memref<256x64xf32, #tpu.memory_space<vmem>>, vector<256x64xf32>
    %cst_14 = arith.constant dense<0.000000e+00> : vector<8x64xf32>
    %16 = tpu.matmul %14, %15, %cst_14 {dimension_numbers = #tpu.dot_dimension_numbers<[1], [0], [0], [1], [0, 0, 1, 1], [], []>} : vector<8x256xf32>, vector<256x64xf32>, vector<8x64xf32> -> vector<8x64xf32>
    %c0_15 = arith.constant 0 : index
    %c0_16 = arith.constant 0 : index
    %17 = vector.load %arg7[%c0_15, %c0_16] : memref<1x64xf32, #tpu.memory_space<vmem>>, vector<1x64xf32>
    %18 = vector.broadcast %17 : vector<1x64xf32> to vector<8x64xf32>
    %19 = arith.addf %16, %18 : vector<8x64xf32>
    %cst_17 = arith.constant dense<0xFF800000> : vector<8xf32>
    %20 = vector.multi_reduction <maximumf>, %19, %cst_17 [1] : vector<8x64xf32> to vector<8xf32>
    %21 = vector.shape_cast %20 : vector<8xf32> to vector<8x1xf32>
    %22 = vector.broadcast %21 : vector<8x1xf32> to vector<8x64xf32>
    %23 = arith.subf %19, %22 : vector<8x64xf32>
    %24 = math.exp %23 : vector<8x64xf32>
    %c0_18 = arith.constant 0 : index
    %c0_19 = arith.constant 0 : index
    %25 = vector.load %arg8[%c0_18, %c0_19] : memref<64x68xf32, #tpu.memory_space<vmem>>, vector<64x64xf32>
    %cst_20 = arith.constant dense<0.000000e+00> : vector<8x64xf32>
    %26 = tpu.matmul %24, %25, %cst_20 {dimension_numbers = #tpu.dot_dimension_numbers<[1], [0], [0], [1], [0, 0, 1, 1], [], []>} : vector<8x64xf32>, vector<64x64xf32>, vector<8x64xf32> -> vector<8x64xf32>
    %cst_21 = arith.constant 1.000000e-30 : f32
    %27 = vector.broadcast %cst_21 : f32 to vector<8x64xf32>
    %28 = arith.maximumf %26, %27 : vector<8x64xf32>
    %29 = arith.divf %24, %28 : vector<8x64xf32>
    %cst_22 = arith.constant 1.000000e-03 : f32
    %30 = vector.broadcast %cst_22 : f32 to vector<8x64xf32>
    %31 = arith.maximumf %29, %30 : vector<8x64xf32>
    %c0_23 = arith.constant 0 : index
    %c64 = arith.constant 64 : index
    %32 = vector.load %arg8[%c0_23, %c64] : memref<64x68xf32, #tpu.memory_space<vmem>>, vector<64x4xf32>
    %cst_24 = arith.constant dense<0.000000e+00> : vector<8x4xf32>
    %33 = tpu.matmul %31, %32, %cst_24 {dimension_numbers = #tpu.dot_dimension_numbers<[1], [0], [0], [1], [0, 0, 1, 1], [], []>} : vector<8x64xf32>, vector<64x4xf32>, vector<8x4xf32> -> vector<8x4xf32>
    %c0_25 = arith.constant 0 : index
    %c0_26 = arith.constant 0 : index
    %34 = vector.load %arg9[%c0_25, %c0_26] : memref<8x4xf32, #tpu.memory_space<vmem>>, vector<8x4xf32>
    tpu.vector_store %arg9[%c0_25, %c0_26], %33 {strides = array<i32>} : memref<8x4xf32, #tpu.memory_space<vmem>>, vector<8x4xf32>,
    return
  }
  func.func @transform_0(%arg0: i32) -> (i32, i32) {
    %c0_i32 = arith.constant 0 : i32
    %c0_i32_0 = arith.constant 0 : i32
    return %arg0, %c0_i32 : i32, i32
  }
  func.func @transform_1(%arg0: i32) -> (i32, i32) {
    %c0_i32 = arith.constant 0 : i32
    %c0_i32_0 = arith.constant 0 : i32
    %c0_i32_1 = arith.constant 0 : i32
    return %c0_i32, %c0_i32_0 : i32, i32
  }
  func.func @transform_2(%arg0: i32) -> (i32, i32) {
    %c0_i32 = arith.constant 0 : i32
    %c0_i32_0 = arith.constant 0 : i32
    %c0_i32_1 = arith.constant 0 : i32
    return %c0_i32, %c0_i32_0 : i32, i32
  }
  func.func @transform_3(%arg0: i32) -> (i32, i32) {
    %c0_i32 = arith.constant 0 : i32
    %c0_i32_0 = arith.constant 0 : i32
    %c0_i32_1 = arith.constant 0 : i32
    return %c0_i32, %c0_i32_0 : i32, i32
  }
  func.func @transform_4(%arg0: i32) -> (i32, i32) {
    %c0_i32 = arith.constant 0 : i32
    %c0_i32_0 = arith.constant 0 : i32
    %c0_i32_1 = arith.constant 0 : i32
    return %c0_i32, %c0_i32_0 : i32, i32
  }
  func.func @transform_5(%arg0: i32) -> (i32, i32) {
    %c0_i32 = arith.constant 0 : i32
    %c0_i32_0 = arith.constant 0 : i32
    %c0_i32_1 = arith.constant 0 : i32
    return %c0_i32, %c0_i32_0 : i32, i32
  }
  func.func @transform_6(%arg0: i32) -> (i32, i32) {
    %c0_i32 = arith.constant 0 : i32
    %c0_i32_0 = arith.constant 0 : i32
    %c0_i32_1 = arith.constant 0 : i32
    return %c0_i32, %c0_i32_0 : i32, i32
  }
  func.func @transform_7(%arg0: i32) -> (i32, i32) {
    %c0_i32 = arith.constant 0 : i32
    %c0_i32_0 = arith.constant 0 : i32
    %c0_i32_1 = arith.constant 0 : i32
    return %c0_i32, %c0_i32_0 : i32, i32
  }
  func.func @transform_8(%arg0: i32) -> (i32, i32) {
    %c0_i32 = arith.constant 0 : i32
    %c0_i32_0 = arith.constant 0 : i32
    return %arg0, %c0_i32 : i32, i32
  }
}

</mosaic_0001>

<bundles_post_ra>
// kernel: tpu_custom_call.1
= control target key start
LH: loop header
LB: loop body
LE: loop exit
PB: predicated region body
PF: predicated region fallthrough
CT: control target
= control target key end

     0   :  { %vm38_vm0 = vcmask 261120   ;;  %vm219_vm1 = vcmask 523264   ;;  %s365_s27 = smov 64   ;;  %vm329_vm6 = vcmask 31744   ;;  %s657_s1 = inlined_call_operand.vmem [shape: f32[32,128], index: 1, kind: input, shape index: {}]   ;;  %s658_s3 = inlined_call_operand.vmem [shape: f32[128,256], index: 3, kind: input, shape index: {}]   ;;  %s659_s0 = inlined_call_operand.vmem [shape: f32[8,32], index: 0, kind: input, shape index: {}]   ;;  %s660_s2 = inlined_call_operand.vmem [shape: f32[1,128], index: 2, kind: input, shape index: {}]   ;;  %s661_s5 = inlined_call_operand.vmem [shape: f32[256,64], index: 5, kind: input, shape index: {}]   ;;  %s662_s6 = inlined_call_operand.vmem [shape: f32[1,64], index: 6, kind: input, shape index: {}]   ;;  %s663_s4 = inlined_call_operand.vmem [shape: f32[1,256], index: 4, kind: input, shape index: {}]   ;;  %s664_s7 = inlined_call_operand.vmem [shape: f32[64,68], index: 7, kind: input, shape index: {}]   ;;  %s665_s8 = inlined_call_operand.vmem [shape: f32[8,4], index: 8, kind: output, shape index: {}]  }
   0x1   :  { %v33_v0 = vld [vmem:[%s657_s1 + $0x18] sm:$0xff]  ;;  %v32_v1 = vld [vmem:[%s657_s1 + $0x10] sm:$0xff]  ;;  %v31_v2 = vld [vmem:[%s657_s1 + $0x8] sm:$0xff] }
   0x2   :  { %54 = vmatpush.msra.mxu0 %v33_v0  ;;  %v93_v3 = vld [vmem:[%s658_s3 + $0xf0] sm:$0xff]  ;;  %v94_v4 = vld [vmem:[%s658_s3 + $0xf8] sm:$0xff]  ;;  %v91_v5 = vld [vmem:[%s658_s3 + $0xe0] sm:$0xff] }
   0x3   :  { %101 = vmatpush.msra.mxu1 %v93_v3  ;;  %v92_v6 = vld [vmem:[%s658_s3 + $0xe8] sm:$0xff]  ;;  %121 = vmatpush.msra.mxu2 %v94_v4  ;;  %v89_v7 = vld [vmem:[%s658_s3 + $0xd0] sm:$0xff]  ;;  %v30_v8 = vld [vmem:[%s657_s1] sm:$0xff] }
   0x4   :  { %55 = vmatpush.msra.mxu0 %v32_v1  ;;  %v90_v9 = vld [vmem:[%s658_s3 + $0xd8] sm:$0xff]  ;;  %v29_v10 = vld [vmem:[%s659_s0] sm:$0xff]  ;;  %v88_v12 = vld [vmem:[%s658_s3 + $0xc8] sm:$0xff] }
   0x5   :  { %102 = vmatpush.msra.mxu1 %v91_v5  ;;  %122 = vmatpush.msra.mxu2 %v92_v6  ;;  %v87_v11 = vld [vmem:[%s658_s3 + $0xc0] sm:$0xff]  ;;  %v85_v13 = vld [vmem:[%s658_s3 + $0xb0] sm:$0xff]  ;;  %v86_v14 = vld [vmem:[%s658_s3 + $0xb8] sm:$0xff] }
   0x6   :  { %56 = vmatpush.msra.mxu0 %v31_v2  ;;  %v83_v15 = vld [vmem:[%s658_s3 + $0xa0] sm:$0xff]  ;;  %v84_v16 = vld [vmem:[%s658_s3 + $0xa8] sm:$0xff]  ;;  %v81_v17 = vld [vmem:[%s658_s3 + $0x90] sm:$0xff] }
   0x7   :  { %103 = vmatpush.msra.mxu1 %v89_v7  ;;  %123 = vmatpush.msra.mxu2 %v90_v9  ;;  %v82_v18 = vld [vmem:[%s658_s3 + $0x98] sm:$0xff]  ;;  %v79_v19 = vld [vmem:[%s658_s3 + $0x80] sm:$0xff]  ;;  %v80_v20 = vld [vmem:[%s658_s3 + $0x88] sm:$0xff] }
   0x8   :  { %57 = vmatpush.msra.mxu0 %v30_v8  ;;  %v77_v21 = vld [vmem:[%s658_s3 + $0x70] sm:$0xff]  ;;  %v78_v22 = vld [vmem:[%s658_s3 + $0x78] sm:$0xff]  ;;  %v75_v23 = vld [vmem:[%s658_s3 + $0x60] sm:$0xff] }
   0x9   :  { %335 = vmatmul.msk.f32.vlgmr.msra.gmra.mxu0 %vm38_vm0, %v29_v10  ;;  %104 = vmatpush.msra.mxu1 %v87_v11  ;;  %v76_v24 = vld [vmem:[%s658_s3 + $0x68] sm:$0xff]  ;;  %v73_v25 = vld [vmem:[%s658_s3 + $0x50] sm:$0xff]  ;;  %v74_v26 = vld [vmem:[%s658_s3 + $0x58] sm:$0xff] }
   0xa   :  { %124 = vmatpush.msra.mxu2 %v88_v12  ;;  %v71_v27 = vld [vmem:[%s658_s3 + $0x40] sm:$0xff]  ;;  %v72_v28 = vld [vmem:[%s658_s3 + $0x48] sm:$0xff]  ;;  %v69_v29 = vld [vmem:[%s658_s3 + $0x30] sm:$0xff] }
   0xb   :  { %105 = vmatpush.msra.mxu1 %v85_v13  ;;  %v70_v30 = vld [vmem:[%s658_s3 + $0x38] sm:$0xff]  ;;  %v67_v31 = vld [vmem:[%s658_s3 + $0x20] sm:$0xff]  ;;  %v68_v32 = vld [vmem:[%s658_s3 + $0x28] sm:$0xff] }
   0xc   :  { %125 = vmatpush.msra.mxu2 %v86_v14  ;;  %v65_v33 = vld [vmem:[%s658_s3 + $0x10] sm:$0xff]  ;;  %v66_v34 = vld [vmem:[%s658_s3 + $0x18] sm:$0xff]  ;;  %v63_v35 = vld [vmem:[%s658_s3] sm:$0xff] }
   0xd   :  { %106 = vmatpush.msra.mxu1 %v83_v15  ;;  %v64_v36 = vld [vmem:[%s658_s3 + $0x8] sm:$0xff]  ;;  %v158_v37 = vld [vmem:[%s661_s5 + $0x78] sm:$0xff]  ;;  %v157_v38 = vld [vmem:[%s661_s5 + $0x70] sm:$0xff] }
   0xe   :  { %126 = vmatpush.msra.mxu2 %v84_v16  ;;  %179 = vmatpush.msra.mxu3 %v158_v37  ;;  %v174_v39 = vld [vmem:[%s661_s5 + $0xf8] sm:$0xff]  ;;  %v156_v40 = vld [vmem:[%s661_s5 + $0x68] sm:$0xff]  ;;  %v173_v41 = vld [vmem:[%s661_s5 + $0xf0] sm:$0xff] }
   0xf   :  { %107 = vmatpush.msra.mxu1 %v81_v17  ;;  %199 = vmatpush.msrb.mxu0 %v174_v39  ;;  %v172_v42 = vld [vmem:[%s661_s5 + $0xe8] sm:$0xff]  ;;  %v155_v43 = vld [vmem:[%s661_s5 + $0x60] sm:$0xff]  ;;  %v154_v45 = vld [vmem:[%s661_s5 + $0x58] sm:$0xff] }
  0x10   :  { %127 = vmatpush.msra.mxu2 %v82_v18  ;;  %180 = vmatpush.msra.mxu3 %v157_v38  ;;  %v171_v44 = vld [vmem:[%s661_s5 + $0xe0] sm:$0xff]  ;;  %v170_v46 = vld [vmem:[%s661_s5 + $0xd8] sm:$0xff]  ;;  %v153_v47 = vld [vmem:[%s661_s5 + $0x50] sm:$0xff] }
  0x11   :  { %108 = vmatpush.msra.mxu1 %v79_v19  ;;  %200 = vmatpush.msrb.mxu0 %v173_v41  ;;  %v169_v48 = vld [vmem:[%s661_s5 + $0xd0] sm:$0xff]  ;;  %v152_v49 = vld [vmem:[%s661_s5 + $0x48] sm:$0xff]  ;;  %v151_v51 = vld [vmem:[%s661_s5 + $0x40] sm:$0xff] }
  0x12   :  { %128 = vmatpush.msra.mxu2 %v80_v20  ;;  %181 = vmatpush.msra.mxu3 %v156_v40  ;;  %v168_v50 = vld [vmem:[%s661_s5 + $0xc8] sm:$0xff]  ;;  %v167_v52 = vld [vmem:[%s661_s5 + $0xc0] sm:$0xff]  ;;  %v150_v53 = vld [vmem:[%s661_s5 + $0x38] sm:$0xff] }
  0x13   :  { %109 = vmatpush.msra.mxu1 %v77_v21  ;;  %201 = vmatpush.msrb.mxu0 %v172_v42  ;;  %v166_v54 = vld [vmem:[%s661_s5 + $0xb8] sm:$0xff]  ;;  %v149_v55 = vld [vmem:[%s661_s5 + $0x30] sm:$0xff]  ;;  %v148_v57 = vld [vmem:[%s661_s5 + $0x28] sm:$0xff] }
  0x14   :  { %129 = vmatpush.msra.mxu2 %v78_v22  ;;  %182 = vmatpush.msra.mxu3 %v155_v43  ;;  %v165_v56 = vld [vmem:[%s661_s5 + $0xb0] sm:$0xff]  ;;  %v147_v58 = vld [vmem:[%s661_s5 + $0x20] sm:$0xff]  ;;  %v146_v59 = vld [vmem:[%s661_s5 + $0x18] sm:$0xff] }
  0x15   :  { %110 = vmatpush.msra.mxu1 %v75_v23  ;;  %202 = vmatpush.msrb.mxu0 %v171_v44  ;;  %v359_v60 = vld [vmem:[%s660_s2] ss:$0 sm:$0xff]  ;;  %v145_v0 = vld [vmem:[%s661_s5 + $0x10] sm:$0xff]  ;;  %v164_v1 = vld [vmem:[%s661_s5 + $0xa8] sm:$0xff] }
  0x16   :  { %130 = vmatpush.msra.mxu2 %v76_v24  ;;  %183 = vmatpush.msra.mxu3 %v154_v45  ;;  %v144_v2 = vld [vmem:[%s661_s5 + $0x8] sm:$0xff]  ;;  %v163_v3 = vld [vmem:[%s661_s5 + $0xa0] sm:$0xff]  ;;  %v162_v5 = vld [vmem:[%s661_s5 + $0x98] sm:$0xff] }
  0x17   :  { %111 = vmatpush.msra.mxu1 %v73_v25  ;;  %203 = vmatpush.msrb.mxu0 %v170_v46  ;;  %v143_v4 = vld [vmem:[%s661_s5] sm:$0xff]  ;;  %v161_v6 = vld [vmem:[%s661_s5 + $0x90] sm:$0xff]  ;;  %v160_v7 = vld [vmem:[%s661_s5 + $0x88] sm:$0xff] }
  0x18   :  { %131 = vmatpush.msra.mxu2 %v74_v26  ;;  %184 = vmatpush.msra.mxu3 %v153_v47  ;;  %v159_v8 = vld [vmem:[%s661_s5 + $0x80] sm:$0xff]  ;;  %v233_v18 = vld [vmem:[%s664_s7 + $0x38] sm:$0xff]  ;;  %v232_v19 = vld [vmem:[%s664_s7 + $0x30] sm:$0xff] }
  0x19   :  { %112 = vmatpush.msra.mxu1 %v71_v27  ;;  %204 = vmatpush.msrb.mxu0 %v169_v48  ;;  %v95_v9 = vld [vmem:[%s663_s4] sm:$0x3]  ;;  %v339_v26 = vpack.i.bf16 %v232_v19, %v233_v18  ;;  %v231_v27 = vld [vmem:[%s664_s7 + $0x28] sm:$0xff] }
  0x1a   :  { %132 = vmatpush.msra.mxu2 %v72_v28  ;;  %185 = vmatpush.msra.mxu3 %v152_v49  ;;  %v97_v10 = vperm.slane %v95_v9, 0  ;;  %v98_v14 = vperm.slane %v95_v9, 1  ;;  %v360_v20 = vld [vmem:[%s662_s6] ss:$0 sm:$0xff] }
  0x1b   :  { %113 = vmatpush.msra.mxu1 %v69_v29  ;;  %205 = vmatpush.msrb.mxu0 %v168_v50  ;;  %v230_v28 = vld [vmem:[%s664_s7 + $0x20] sm:$0xff]  ;;  %v229_v29 = vld [vmem:[%s664_s7 + $0x18] sm:$0xff] }
  0x1c   :  { %133 = vmatpush.msra.mxu2 %v70_v30  ;;  %186 = vmatpush.msra.mxu3 %v151_v51  ;;  %v228_v30 = vld [vmem:[%s664_s7 + $0x10] sm:$0xff] }
  0x1d   :  { %114 = vmatpush.msra.mxu1 %v67_v31  ;;  %206 = vmatpush.msrb.mxu0 %v167_v52  ;;  %v227_v31 = vld [vmem:[%s664_s7 + $0x8] sm:$0xff] }
  0x1e   :  { %134 = vmatpush.msra.mxu2 %v68_v32  ;;  %187 = vmatpush.msra.mxu3 %v150_v53  ;;  %v226_v32 = vld [vmem:[%s664_s7] sm:$0xff] }
  0x1f   :  { %115 = vmatpush.msra.mxu1 %v65_v33  ;;  %207 = vmatpush.msrb.mxu0 %v166_v54  ;;  %v344_v33 = vpack.i.bf16 %v230_v28, %v231_v27 }
  0x20   :  { %135 = vmatpush.msra.mxu2 %v66_v34  ;;  %188 = vmatpush.msra.mxu3 %v149_v55  ;;  %v354_v34 = vpack.i.bf16 %v226_v32, %v227_v31 }
  0x21   :  { %116 = vmatpush.msra.mxu1 %v63_v35  ;;  %208 = vmatpush.msrb.mxu0 %v165_v56  ;;  %v349_v35 = vpack.i.bf16 %v228_v30, %v229_v29 }
  0x22   :  { %136 = vmatpush.msra.mxu2 %v64_v36  ;;  %189 = vmatpush.msra.mxu3 %v148_v57 }
  0x23   :  { %209 = vmatpush.msrb.mxu0 %v164_v1  ;;  %245 = vmatpush.msrb.mxu1 %v233_v18 }
  0x24   :  { %190 = vmatpush.msra.mxu3 %v147_v58  ;;  %345 = vrot.lane.b32.xlu1 %v344_v33, %s365_s27 }
  0x25   :  { %210 = vmatpush.msrb.mxu0 %v163_v3  ;;  %246 = vmatpush.msrb.mxu1 %v232_v19 }
  0x26   :  { %191 = vmatpush.msra.mxu3 %v146_v59  ;;  %355 = vrot.lane.b32.xlu2 %v354_v34, %s365_s27 }
  0x27   :  { %211 = vmatpush.msrb.mxu0 %v162_v5  ;;  %247 = vmatpush.msrb.mxu1 %v231_v27 }
  0x28   :  { %192 = vmatpush.msra.mxu3 %v145_v0 }
  0x29   :  { %212 = vmatpush.msrb.mxu0 %v161_v6  ;;  %248 = vmatpush.msrb.mxu1 %v230_v28 }
  0x2a   :  { %193 = vmatpush.msra.mxu3 %v144_v2 }
  0x2b   :  { %213 = vmatpush.msrb.mxu0 %v160_v7  ;;  %249 = vmatpush.msrb.mxu1 %v229_v29 }
  0x2c   :  { %194 = vmatpush.msra.mxu3 %v143_v4  ;;  %350 = vrot.lane.b32.xlu1 %v349_v35, %s365_s27 }
  0x2d   :  { %214 = vmatpush.msrb.mxu0 %v159_v8  ;;  %250 = vmatpush.msrb.mxu1 %v228_v30 }
  0x2f   :  { %251 = vmatpush.msrb.mxu1 %v227_v31 }
  0x31   :  { %252 = vmatpush.msrb.mxu1 %v226_v32 }
  0x80   :  { %v356_v49 = vpop.permute.xlu2 %355 }
  0x81   :  { %v357_v50 = vunpack.i.l.bf16 %v356_v49  ;;  %v358_v51 = vunpack.i.h.bf16 %v356_v49 }
  0x86   :  { %v59_v61 = vpop.f32.mrf.mxu0 }
  0x87   :  { %v60_v62 = vadd.f32 %v359_v60, %v59_v61 }
  0x89   :  { %v62_v63 = vmax.f32 %v60_v62, 0.0 }
  0x8b   :  { %117 = vmatmul.f32.vlgmr.msra.gmra.mxu1 %v62_v63  ;;  %137 = vmatmul.f32.vlgmr.msra.gmra.mxu2 %v62_v63 }
  0x96   :  { %v346_v43 = vpop.permute.xlu1 %345 }
  0x97   :  { %v347_v44 = vunpack.i.l.bf16 %v346_v43  ;;  %v348_v45 = vunpack.i.h.bf16 %v346_v43 }
  0x9e   :  { %v351_v46 = vpop.permute.xlu1 %350 }
  0x9f   :  { %v352_v47 = vunpack.i.l.bf16 %v351_v46  ;;  %v353_v48 = vunpack.i.h.bf16 %v351_v46 }
 0x108   :  { %v118_v11 = vpop.f32.mrf.mxu1 }
 0x109   :  { %v119_v12 = vadd.f32 %v118_v11, %v97_v10 }
 0x10b   :  { %v141_v13 = vmax.f32 %v119_v12, 0.0 }
 0x10d   :  { %195 = vmatmul.f32.vlgmr.msra.gmra.mxu3 %v141_v13 }
 0x10e   :  { %v138_v15 = vpop.f32.mrf.mxu2 }
 0x10f   :  { %v139_v16 = vadd.f32 %v138_v15, %v98_v14 }
 0x111   :  { %v142_v17 = vmax.f32 %v139_v16, 0.0 }
 0x113   :  { %215 = vmatmul.f32.vlgmr.msrb.gmra.mxu0 %v142_v17 }
 0x190   :  { %v196_v21 = vpop.f32.mrf.mxu3  ;;  %v216_v23 = vpop.f32.mrf.mxu0 }
 0x191   :  { %v197_v22 = vadd.f32 %v360_v20, %v196_v21 }
 0x193   :  { %v217_v24 = vadd.f32 %v216_v23, %v197_v22 }
 0x195   :  { %v220_v25 = vsel %vm219_vm1, %v217_v24, -inf }
 0x196   :  { %221 = vmax.xlane.f32.xlu0 %v220_v25 }
 0x1aa   :  { %340 = vrot.lane.b32.xlu0 %v339_v26, %s365_s27 }
 0x209   :  { %v222_v36 = vpop.xlane.xlu0 %221 }
 0x20a   :  { %v223_v37 = vsub.f32 %v217_v24, %v222_v36 }
 0x20c   :  { %v224_v38 = vmul.f32 1.442695, %v223_v37 }
 0x20e   :  { %361 = vpow2.f32 %v224_v38 }
 0x214   :  { %v362_v39 = vpop.eup %361 }
 0x215   :  { %336 = vmatmul.msk.f32.vlgmr.msrb.gmra.mxu1 %vm219_vm1, %v362_v39 }
 0x21c   :  { %v341_v40 = vpop.permute.xlu0 %340 }
 0x21d   :  { %v342_v41 = vunpack.i.l.bf16 %v341_v40  ;;  %v343_v42 = vunpack.i.h.bf16 %v341_v40 }
 0x21f   :  { %317 = vmatpush.msrb.mxu2 %v342_v41 }
 0x221   :  { %318 = vmatpush.msrb.mxu2 %v343_v42 }
 0x223   :  { %319 = vmatpush.msrb.mxu2 %v347_v44 }
 0x225   :  { %320 = vmatpush.msrb.mxu2 %v348_v45 }
 0x227   :  { %321 = vmatpush.msrb.mxu2 %v352_v47 }
 0x229   :  { %322 = vmatpush.msrb.mxu2 %v353_v48 }
 0x22b   :  { %323 = vmatpush.msrb.mxu2 %v357_v50 }
 0x22d   :  { %324 = vmatpush.msrb.mxu2 %v358_v51 }
 0x292   :  { %v254_v52 = vpop.f32.mrf.mxu1 }
 0x293   :  { %v257_v53 = vmax.f32 %v254_v52, 1e-30 }
 0x295   :  { %363 = vrcp.f32 %v257_v53  ;;  %v269_v57 = vand.u32 2147483648, %v257_v53  ;;  %v267_v59 = vand.u32 2147483647, %v257_v53  ;;  %vm263_vm3 = vweird.f32 %v257_v53 }
 0x297   :  { %v270_v61 = vor.u32 1.1754944e-38, %v269_v57  ;;  %vm268_vm5 = vcmp.eq.f32.partialorder %v267_v59, 8.507059e+37 }
 0x29b   :  { %v364_v54 = vpop.eup %363 }
 0x29c   :  { %v259_v55 = vmul.f32 %v364_v54, %v257_v53  ;;  %vm264_vm2 = vweird.f32 %v364_v54 }
 0x29d   :  { %vm265_vm4 = vmor %vm263_vm3, %vm264_vm2 }
 0x29e   :  { %v260_v56 = vsub.f32 1.0, %v259_v55 }
 0x2a0   :  { %v261_v58 = vmul.f32 %v364_v54, %v260_v56 }
 0x2a2   :  { %v262_v60 = vadd.f32 %v364_v54, %v261_v58 }
 0x2a4   :  { %v266_v62 = vsel %vm265_vm4, %v364_v54, %v262_v60 }
 0x2a5   :  { %v271_v63 = vsel %vm268_vm5, %v270_v61, %v266_v62 }
 0x2a6   :  { %v272_v0 = vmul.f32 %v362_v39, %v271_v63 }
 0x2a8   :  { %v273_v1 = vmax.f32 %v272_v0, 0.001 }
 0x2aa   :  { %337 = vmatmul.msk.f32.vlgmr.msrb.gmra.mxu2 %vm219_vm1, %v273_v1 }
 0x32d   :  { %v326_v2 = vpop.f32.mrf.mxu2 }
 0x32e   :  { %330 = vst.msk [vmem:[%s665_s8] sm:$0xff] %vm329_vm6, %v326_v2 }

</bundles_post_ra>
